<compile_context>
chip_gen: v7x
topology: tpu7x:2x2x1
jax: 0.10.0
libtpu: 0.0.40
codegen_flags: <defaults>
</compile_context>

<pallas_src>
import functools

import jax
import jax.numpy as jnp
from jax import lax
from jax.experimental import pallas as pl
from jax.experimental.pallas import tpu as pltpu


def _round_up(x, m):
    return (x + m - 1) // m * m


# ---------------------------------------------------------------------------
# Fused Pallas kernel
# ---------------------------------------------------------------------------
def _make_kernel(*, Cin, Cout, k, stride, pad, halo_off, Lt, Lv, use_res,
                 fuse_conv2):
    """Fused conv1+BN1+tanh -> conv2+BN2 (+1x1 shortcut+BNsc) -> ReLU.

    Ref shapes (per grid step = one batch element; Lt = lane-padded length):
      x_ref   : (1, stride*Cin, Lq)   stride-deinterleaved, zero-padded input
      w1_ref  : (M1, k*Cin)           BN1-folded conv1 weights, tap-major cols;
                                      rows [Cout:2Cout] = folded 1x1 shortcut
                                      placed in the tap==pad columns [use_res]
      b1_ref  : (Cout, 1)             BN1 shift
      w2_ref  : (Cout, k*Cout)        BN2-folded conv2 weights, tap-major cols
      b2_ref  : (Cout, 1)             BN2 shift
      bsc_ref : (Cout, 1)             BNsc shift                     [use_res]
      o_ref   : (1, Cout, Lt)         padded output block (NCL layout)
      x2_ref  : (k*Cin, Lt)           VMEM im2col slab for conv1
      h_ref   : (Cout, halo_off+Lt+pad)  tanh activation + zero halo
      h2_ref  : (k*Cout, Lt)          VMEM im2col slab for conv2  [fuse_conv2]
    """

    def kernel(x_ref, w1_ref, b1_ref, w2_ref, b2_ref, *rest):
        if use_res:
            bsc_ref, o_ref, *scratch = rest
        else:
            o_ref, *scratch = rest
        if fuse_conv2:
            x2_ref, h_ref, h2_ref = scratch
        else:
            x2_ref, h_ref = scratch

        # ---- stage conv1 taps as one (k*Cin, Lt) VMEM im2col slab ----------
        # Output position i, tap j reads padded-input position i*stride + j,
        # i.e. phase r = j % stride, offset q = j // stride of the
        # stride-deinterleaved input -> contiguous lane slices (1x bytes).
        for j in range(k):
            r, q = j % stride, j // stride
            x2_ref[j * Cin:(j + 1) * Cin, :] = \
                x_ref[0, r * Cin:(r + 1) * Cin, q:q + Lt]

        # ---- conv1 + BN1 (+ fused 1x1 shortcut rows): ONE big-K MXU dot ----
        y = jnp.dot(w1_ref[...], x2_ref[...],
                    preferred_element_type=jnp.float32)        # (M1, Lt) f32
        h = jnp.tanh(y[:Cout, :] + b1_ref[...])                # (Cout, Lt)

        # Zero the lane-padding tail so conv2's implicit zero padding of its
        # true length-Lv input stays exact.
        if Lv < Lt:
            lane = lax.broadcasted_iota(jnp.int32, (Cout, Lt), 1)
            h = jnp.where(lane < Lv, h, 0.0)

        # ---- stage h (128-aligned store) + re-zero only the 2*pad halo -----
        if pad > 0:
            h_ref[:, halo_off - pad:halo_off] = jnp.zeros(
                (Cout, pad), h_ref.dtype)
            h_ref[:, halo_off + Lt:halo_off + Lt + pad] = jnp.zeros(
                (Cout, pad), h_ref.dtype)
        h_ref[:, halo_off:halo_off + Lt] = h.astype(h_ref.dtype)

        # ---- conv2 + BN2 ----------------------------------------------------
        if fuse_conv2:
            for j in range(k):
                h2_ref[j * Cout:(j + 1) * Cout, :] = \
                    h_ref[:, halo_off - pad + j:halo_off - pad + j + Lt]
            y2 = jnp.dot(w2_ref[...], h2_ref[...],
                         preferred_element_type=jnp.float32)
        else:
            y2 = None
            for j in range(k):
                part = jnp.dot(
                    w2_ref[:, j * Cout:(j + 1) * Cout],
                    h_ref[:, halo_off - pad + j:halo_off - pad + j + Lt],
                    preferred_element_type=jnp.float32)
                y2 = part if y2 is None else y2 + part
        left = y2 + b2_ref[...]

        # ---- residual shortcut (matmul already done inside the conv1 dot) --
        if use_res:
            left = left + y[Cout:, :] + bsc_ref[...]

        # ---- ReLU (dropout = identity in eval mode) -------------------------
        o_ref[0] = jnp.maximum(left, 0.0).astype(o_ref.dtype)

    return kernel


# ---------------------------------------------------------------------------
# Wrapper
# ---------------------------------------------------------------------------
def _bn_fold(gamma, beta, mean, var, eps=1e-5):
    """Eval-mode BatchNorm1d as per-channel scale / shift."""
    scale = gamma / jnp.sqrt(var + eps)
    shift = beta - mean * scale
    return scale, shift


def residual_block_forward(x, params, *, kernel_size, stride, use_res,
                           compute_dtype=jnp.bfloat16):
    """x: (N, Cin, L) float32 (NCL, as in PyTorch). Returns (N, Cout, L_out).

    compute_dtype: dtype of the input slab / folded weights / VMEM scratch fed
    to the MXU (accumulation is always f32). Default bf16 halves HBM traffic
    for this memory-bound block; pass jnp.float32 for bit-tight results.
    """
    if kernel_size % 2 != 1:
        raise ValueError("kernel_size must be odd (the PyTorch module's length "
                         "arithmetic also requires this for the residual add).")
    N, Cin, L = x.shape
    Cout = params["w1"].shape[0]
    k, s = kernel_size, stride
    p = k // 2
    Lv = (L + 2 * p - k) // s + 1                  # true output length
    Lt = _round_up(Lv, 128)                        # lane-padded output tile
    q_max = (k - 1) // s
    Lq = _round_up(max(-(-(L + 2 * p) // s), q_max + Lt), 128)
    halo_off = 128 if p > 0 else 0                 # 128-aligned h interior
    fuse_conv2 = Cout < 128                        # big-K conv2 only if MXU underfilled

    # ---- stride-deinterleave the zero-padded input (pure permutation) ------
    # x_de[n, r*Cin + c, q] = x_padded[n, c, q*s + r]
    x_pad = jnp.pad(x.astype(jnp.float32),
                    ((0, 0), (0, 0), (p, s * Lq - L - p)))
    x_de = (x_pad.reshape(N, Cin, Lq, s)
                 .transpose(0, 3, 1, 2)
                 .reshape(N, s * Cin, Lq)
                 .astype(compute_dtype))

    # ---- fold BN scale into conv weights (tap-major columns = slab rows) ---
    sc1, sh1 = _bn_fold(*params["bn1"])
    w1f = ((params["w1"] * sc1[:, None, None])           # (Cout, Cin, k)
           .transpose(0, 2, 1).reshape(Cout, k * Cin))   # col = j*Cin + c
    b1 = sh1[:, None].astype(jnp.float32)

    sc2, sh2 = _bn_fold(*params["bn2"])
    w2f = ((params["w2"] * sc2[:, None, None])
           .transpose(0, 2, 1).reshape(Cout, k * Cout)   # col = j*Cout + i
           ).astype(compute_dtype)
    b2 = sh2[:, None].astype(jnp.float32)

    if use_res:
        scs, shs = _bn_fold(*params["bnsc"])
        wsc = params["wsc"].reshape(Cout, Cin) * scs[:, None]
        # The 1x1 shortcut input is exactly the tap j == pad slice -> embed it
        # as extra LHS rows of the conv1 dot (zero elsewhere).
        wsc_rows = jnp.zeros((Cout, k * Cin), w1f.dtype).at[
            :, p * Cin:(p + 1) * Cin].set(wsc)
        w1cat = jnp.concatenate([w1f, wsc_rows], axis=0).astype(compute_dtype)
        bsc = shs[:, None].astype(jnp.float32)
    else:
        w1cat = w1f.astype(compute_dtype)
    M1 = w1cat.shape[0]

    operands = [x_de, w1cat, b1, w2f, b2]
    in_specs = [
        pl.BlockSpec((1, s * Cin, Lq), lambda n: (n, 0, 0)),
        pl.BlockSpec((M1, k * Cin), lambda n: (0, 0)),
        pl.BlockSpec((Cout, 1), lambda n: (0, 0)),
        pl.BlockSpec((Cout, k * Cout), lambda n: (0, 0)),
        pl.BlockSpec((Cout, 1), lambda n: (0, 0)),
    ]
    if use_res:
        operands.append(bsc)
        in_specs.append(pl.BlockSpec((Cout, 1), lambda n: (0, 0)))

    scratch = [pltpu.VMEM((k * Cin, Lt), compute_dtype),
               pltpu.VMEM((Cout, halo_off + Lt + p), compute_dtype)]
    if fuse_conv2:
        scratch.append(pltpu.VMEM((k * Cout, Lt), compute_dtype))

    # ---- explicit VMEM budget (double-buffered blocks + resident scratch) --
    isz = jnp.dtype(compute_dtype).itemsize
    need = (2 * (s * Cin * Lq * isz)                       # x block x2
            + 2 * (Cout * Lt * 4)                          # out block x2
            + 2 * ((M1 * k * Cin + Cout * k * Cout) * isz + 3 * Cout * 4)
            + (k * Cin * Lt + Cout * (halo_off + Lt + p)
               + (k * Cout * Lt if fuse_conv2 else 0)) * isz)
    vmem_limit = int(min(max(2 * need + (2 << 20), 16 << 20), 120 << 20))

    kernel = _make_kernel(Cin=Cin, Cout=Cout, k=k, stride=s, pad=p,
                          halo_off=halo_off, Lt=Lt, Lv=Lv, use_res=use_res,
                          fuse_conv2=fuse_conv2)

    out = pl.pallas_call(
        kernel,
        out_shape=jax.ShapeDtypeStruct((N, Cout, Lt), jnp.float32),
        grid=(N,),
        in_specs=in_specs,
        out_specs=pl.BlockSpec((1, Cout, Lt), lambda n: (n, 0, 0)),
        scratch_shapes=scratch,
        compiler_params=pltpu.CompilerParams(
            dimension_semantics=("parallel",),
            vmem_limit_bytes=vmem_limit),
    )(*operands)

    # TODO(synk): for very long L add a second "parallel" L-tile grid axis
    # (halo via pl.Element offsets) so v7x's two TensorCores stay busy and the
    # per-step block fits its 64 MiB VMEM; for small N / short L, pack batch
    # rows along the lane axis instead of one tiny block per grid step.
    # TODO(synk): the wrapper-side pad+deinterleave is one extra HBM pass over
    # x; fuse into the producer or replace with in-kernel strided DMA if it
    # shows up in profiles.
    # TODO(synk): Dropout is identity in eval mode; training-mode dropout would
    # need pltpu.prng_* and cannot match torch's RNG stream exactly.
    return out[:, :, :Lv]


# ---------------------------------------------------------------------------
# Pure-JAX reference (for silent correctness check)
# ---------------------------------------------------------------------------
def _reference(x, params, *, kernel_size, stride, use_res):
    pad = kernel_size // 2
    dn = ("NCH", "OIH", "NCH")

    def conv(x_, w, s, p):
        return lax.conv_general_dilated(x_, w, (s,), [(p, p)],
                                        dimension_numbers=dn)

    def bn(y, gamma, beta, mean, var, eps=1e-5):
        sc = gamma / jnp.sqrt(var + eps)
        sh = beta - mean * sc
        return y * sc[None, :, None] + sh[None, :, None]

    h = jnp.tanh(bn(conv(x, params["w1"], stride, pad), *params["bn1"]))
    left = bn(conv(h, params["w2"], 1, pad), *params["bn2"])
    if use_res:
        left = left + bn(conv(x, params["wsc"], stride, 0), *params["bnsc"])
    return jnp.maximum(left, 0.0)


# ---------------------------------------------------------------------------
if __name__ == "__main__":
    Cin, Cout = 4, 8
    kernel_size = 3                      # dropout p unused (eval mode)

    key = jax.random.PRNGKey(0)
    ks = jax.random.split(key, 17)

    def bn_params(k0, k1, k2, k3, c):
        gamma = 1.0 + 0.1 * jax.random.normal(k0, (c,), jnp.float32)
        beta = 0.1 * jax.random.normal(k1, (c,), jnp.float32)
        mean = 0.1 * jax.random.normal(k2, (c,), jnp.float32)
        var = 1.0 + 0.1 * jnp.abs(jax.random.normal(k3, (c,), jnp.float32))
        return (gamma, beta, mean, var)

    params = {
        "w1": 0.1 * jax.random.normal(ks[0], (Cout, Cin, kernel_size), jnp.float32),
        "bn1": bn_params(ks[1], ks[2], ks[3], ks[4], Cout),
        "w2": 0.1 * jax.random.normal(ks[5], (Cout, Cout, kernel_size), jnp.float32),
        "bn2": bn_params(ks[6], ks[7], ks[8], ks[9], Cout),
        "wsc": 0.1 * jax.random.normal(ks[10], (Cout, Cin, 1), jnp.float32),
        "bnsc": bn_params(ks[11], ks[12], ks[13], ks[14], Cout),
    }
    x_small = jax.random.normal(ks[15], (2, Cin, 16), jnp.float32)
    x_big = jax.random.normal(ks[16], (2, Cin, 256), jnp.float32)

    cases = [
        # (x, stride, use_res, compute_dtype, tol)  -- covers masked-tail
        # (L1 < 128), exactly-aligned (L1 == 128), bf16 and f32 paths.
        (x_small, 2, True, jnp.bfloat16, 2e-2),
        (x_small, 1, False, jnp.float32, 2e-4),
        (x_big, 2, True, jnp.bfloat16, 2e-2),
    ]
    ok = True
    for xin, stride, use_res, cdt, tol in cases:
        fwd = jax.jit(functools.partial(
            residual_block_forward, kernel_size=kernel_size, stride=stride,
            use_res=use_res, compute_dtype=cdt))
        out = jax.block_until_ready(fwd(xin, params))
        ref = _reference(xin, params, kernel_size=kernel_size, stride=stride,
                         use_res=use_res)
        ok = ok and (out.shape == ref.shape)
        ok = ok and bool(jnp.allclose(out, ref, atol=tol, rtol=tol))
    assert ok
    print("KERNEL_OK")
</pallas_src>

<mosaic_0001>
module attributes {stable_mosaic.version = 11 : i64} {
  func.func @kernel(%arg0: i32, %arg1: memref<1x8x256xbf16, #tpu.memory_space<vmem>>, %arg2: memref<16x12xbf16, #tpu.memory_space<vmem>>, %arg3: memref<8x1xf32, #tpu.memory_space<vmem>>, %arg4: memref<8x24xbf16, #tpu.memory_space<vmem>>, %arg5: memref<8x1xf32, #tpu.memory_space<vmem>>, %arg6: memref<8x1xf32, #tpu.memory_space<vmem>>, %arg7: memref<1x8x128xf32, #tpu.memory_space<vmem>>, %arg8: memref<12x128xbf16, #tpu.memory_space<vmem>>, %arg9: memref<8x257xbf16, #tpu.memory_space<vmem>>, %arg10: memref<24x128xbf16, #tpu.memory_space<vmem>>) attributes {dimension_semantics = [#tpu.dimension_semantics<parallel>], iteration_bounds = array<i64: 2>, scalar_prefetch = 0 : i64, scratch_operands = 3 : i64, tpu.core_type = #tpu.core_type<tc>, window_params = [{transform_indices = @transform_0, window_bounds = array<i64: 1, 8, 256>}, {pipeline_mode = #tpu.pipeline_mode<synchronous>, transform_indices = @transform_1, window_bounds = array<i64: 16, 12>}, {pipeline_mode = #tpu.pipeline_mode<synchronous>, transform_indices = @transform_2, window_bounds = array<i64: 8, 1>}, {pipeline_mode = #tpu.pipeline_mode<synchronous>, transform_indices = @transform_3, window_bounds = array<i64: 8, 24>}, {pipeline_mode = #tpu.pipeline_mode<synchronous>, transform_indices = @transform_4, window_bounds = array<i64: 8, 1>}, {pipeline_mode = #tpu.pipeline_mode<synchronous>, transform_indices = @transform_5, window_bounds = array<i64: 8, 1>}, {transform_indices = @transform_6, window_bounds = array<i64: 1, 8, 128>}]} {
    %c0 = arith.constant 0 : index
    %c0_0 = arith.constant 0 : index
    %c0_1 = arith.constant 0 : index
    %0 = vector.load %arg1[%c0, %c0_0, %c0_1] : memref<1x8x256xbf16, #tpu.memory_space<vmem>>, vector<1x4x128xbf16>
    %1 = vector.shape_cast %0 : vector<1x4x128xbf16> to vector<4x128xbf16>
    %c0_2 = arith.constant 0 : index
    %c0_3 = arith.constant 0 : index
    %2 = vector.load %arg8[%c0_2, %c0_3] : memref<12x128xbf16, #tpu.memory_space<vmem>>, vector<4x128xbf16>
    tpu.vector_store %arg8[%c0_2, %c0_3], %1 {strides = array<i32>} : memref<12x128xbf16, #tpu.memory_space<vmem>>, vector<4x128xbf16>,
    %c0_4 = arith.constant 0 : index
    %c4 = arith.constant 4 : index
    %c0_5 = arith.constant 0 : index
    %3 = vector.load %arg1[%c0_4, %c4, %c0_5] : memref<1x8x256xbf16, #tpu.memory_space<vmem>>, vector<1x4x128xbf16>
    %4 = vector.shape_cast %3 : vector<1x4x128xbf16> to vector<4x128xbf16>
    %c4_6 = arith.constant 4 : index
    %c0_7 = arith.constant 0 : index
    %5 = vector.load %arg8[%c4_6, %c0_7] : memref<12x128xbf16, #tpu.memory_space<vmem>>, vector<4x128xbf16>
    tpu.vector_store %arg8[%c4_6, %c0_7], %4 {strides = array<i32>} : memref<12x128xbf16, #tpu.memory_space<vmem>>, vector<4x128xbf16>,
    %c0_8 = arith.constant 0 : index
    %c0_9 = arith.constant 0 : index
    %c1 = arith.constant 1 : index
    %6 = vector.load %arg1[%c0_8, %c0_9, %c1] : memref<1x8x256xbf16, #tpu.memory_space<vmem>>, vector<1x4x128xbf16>
    %7 = vector.shape_cast %6 : vector<1x4x128xbf16> to vector<4x128xbf16>
    %c8 = arith.constant 8 : index
    %c0_10 = arith.constant 0 : index
    %8 = vector.load %arg8[%c8, %c0_10] : memref<12x128xbf16, #tpu.memory_space<vmem>>, vector<4x128xbf16>
    tpu.vector_store %arg8[%c8, %c0_10], %7 {strides = array<i32>} : memref<12x128xbf16, #tpu.memory_space<vmem>>, vector<4x128xbf16>,
    %c0_11 = arith.constant 0 : index
    %c0_12 = arith.constant 0 : index
    %9 = vector.load %arg2[%c0_11, %c0_12] : memref<16x12xbf16, #tpu.memory_space<vmem>>, vector<16x12xbf16>
    %c0_13 = arith.constant 0 : index
    %c0_14 = arith.constant 0 : index
    %10 = vector.load %arg8[%c0_13, %c0_14] : memref<12x128xbf16, #tpu.memory_space<vmem>>, vector<12x128xbf16>
    %cst = arith.constant dense<0.000000e+00> : vector<16x128xf32>
    %11 = tpu.matmul %9, %10, %cst {dimension_numbers = #tpu.dot_dimension_numbers<[1], [0], [0], [1], [0, 0, 1, 1], [], []>} : vector<16x12xbf16>, vector<12x128xbf16>, vector<16x128xf32> -> vector<16x128xf32>
    %12 = vector.extract_strided_slice %11 {offsets = [0, 0], sizes = [8, 128], strides = [1, 1]} : vector<16x128xf32> to vector<8x128xf32>
    %c0_15 = arith.constant 0 : index
    %c0_16 = arith.constant 0 : index
    %13 = vector.load %arg3[%c0_15, %c0_16] : memref<8x1xf32, #tpu.memory_space<vmem>>, vector<8x1xf32>
    %14 = vector.broadcast %13 : vector<8x1xf32> to vector<8x128xf32>
    %15 = arith.addf %12, %14 : vector<8x128xf32>
    %16 = math.tanh %15 : vector<8x128xf32>
    %17 = tpu.iota {dimensions = array<i32: 1>} : vector<8x128xi32>
    %c8_i32 = arith.constant 8 : i32
    %18 = vector.broadcast %c8_i32 : i32 to vector<8x128xi32>
    %19 = arith.cmpi slt, %17, %18 : vector<8x128xi32>
    %cst_17 = arith.constant 0.000000e+00 : f32
    %20 = vector.broadcast %cst_17 : f32 to vector<8x128xf32>
    %21 = arith.select %19, %16, %20 : vector<8x128xi1>, vector<8x128xf32>
    %cst_18 = arith.constant 0.000000e+00 : bf16
    %22 = vector.broadcast %cst_18 : bf16 to vector<8x1xbf16>
    %c0_19 = arith.constant 0 : index
    %c127 = arith.constant 127 : index
    %23 = vector.load %arg9[%c0_19, %c127] : memref<8x257xbf16, #tpu.memory_space<vmem>>, vector<8x1xbf16>
    tpu.vector_store %arg9[%c0_19, %c127], %22 {strides = array<i32>} : memref<8x257xbf16, #tpu.memory_space<vmem>>, vector<8x1xbf16>,
    %cst_20 = arith.constant 0.000000e+00 : bf16
    %24 = vector.broadcast %cst_20 : bf16 to vector<8x1xbf16>
    %c0_21 = arith.constant 0 : index
    %c256 = arith.constant 256 : index
    %25 = vector.load %arg9[%c0_21, %c256] : memref<8x257xbf16, #tpu.memory_space<vmem>>, vector<8x1xbf16>
    tpu.vector_store %arg9[%c0_21, %c256], %24 {strides = array<i32>} : memref<8x257xbf16, #tpu.memory_space<vmem>>, vector<8x1xbf16>,
    %26 = arith.truncf %21 : vector<8x128xf32> to vector<8x128xbf16>
    %c0_22 = arith.constant 0 : index
    %c128 = arith.constant 128 : index
    %27 = vector.load %arg9[%c0_22, %c128] : memref<8x257xbf16, #tpu.memory_space<vmem>>, vector<8x128xbf16>
    tpu.vector_store %arg9[%c0_22, %c128], %26 {strides = array<i32>} : memref<8x257xbf16, #tpu.memory_space<vmem>>, vector<8x128xbf16>,
    %c0_23 = arith.constant 0 : index
    %c127_24 = arith.constant 127 : index
    %28 = vector.load %arg9[%c0_23, %c127_24] : memref<8x257xbf16, #tpu.memory_space<vmem>>, vector<8x128xbf16>
    %c0_25 = arith.constant 0 : index
    %c0_26 = arith.constant 0 : index
    %29 = vector.load %arg10[%c0_25, %c0_26] : memref<24x128xbf16, #tpu.memory_space<vmem>>, vector<8x128xbf16>
    tpu.vector_store %arg10[%c0_25, %c0_26], %28 {strides = array<i32>} : memref<24x128xbf16, #tpu.memory_space<vmem>>, vector<8x128xbf16>,
    %c0_27 = arith.constant 0 : index
    %c128_28 = arith.constant 128 : index
    %30 = vector.load %arg9[%c0_27, %c128_28] : memref<8x257xbf16, #tpu.memory_space<vmem>>, vector<8x128xbf16>
    %c8_29 = arith.constant 8 : index
    %c0_30 = arith.constant 0 : index
    %31 = vector.load %arg10[%c8_29, %c0_30] : memref<24x128xbf16, #tpu.memory_space<vmem>>, vector<8x128xbf16>
    tpu.vector_store %arg10[%c8_29, %c0_30], %30 {strides = array<i32>} : memref<24x128xbf16, #tpu.memory_space<vmem>>, vector<8x128xbf16>,
    %c0_31 = arith.constant 0 : index
    %c129 = arith.constant 129 : index
    %32 = vector.load %arg9[%c0_31, %c129] : memref<8x257xbf16, #tpu.memory_space<vmem>>, vector<8x128xbf16>
    %c16 = arith.constant 16 : index
    %c0_32 = arith.constant 0 : index
    %33 = vector.load %arg10[%c16, %c0_32] : memref<24x128xbf16, #tpu.memory_space<vmem>>, vector<8x128xbf16>
    tpu.vector_store %arg10[%c16, %c0_32], %32 {strides = array<i32>} : memref<24x128xbf16, #tpu.memory_space<vmem>>, vector<8x128xbf16>,
    %c0_33 = arith.constant 0 : index
    %c0_34 = arith.constant 0 : index
    %34 = vector.load %arg4[%c0_33, %c0_34] : memref<8x24xbf16, #tpu.memory_space<vmem>>, vector<8x24xbf16>
    %c0_35 = arith.constant 0 : index
    %c0_36 = arith.constant 0 : index
    %35 = vector.load %arg10[%c0_35, %c0_36] : memref<24x128xbf16, #tpu.memory_space<vmem>>, vector<24x128xbf16>
    %cst_37 = arith.constant dense<0.000000e+00> : vector<8x128xf32>
    %36 = tpu.matmul %34, %35, %cst_37 {dimension_numbers = #tpu.dot_dimension_numbers<[1], [0], [0], [1], [0, 0, 1, 1], [], []>} : vector<8x24xbf16>, vector<24x128xbf16>, vector<8x128xf32> -> vector<8x128xf32>
    %c0_38 = arith.constant 0 : index
    %c0_39 = arith.constant 0 : index
    %37 = vector.load %arg5[%c0_38, %c0_39] : memref<8x1xf32, #tpu.memory_space<vmem>>, vector<8x1xf32>
    %38 = vector.broadcast %37 : vector<8x1xf32> to vector<8x128xf32>
    %39 = arith.addf %36, %38 : vector<8x128xf32>
    %40 = vector.extract_strided_slice %11 {offsets = [8, 0], sizes = [8, 128], strides = [1, 1]} : vector<16x128xf32> to vector<8x128xf32>
    %41 = arith.addf %39, %40 : vector<8x128xf32>
    %c0_40 = arith.constant 0 : index
    %c0_41 = arith.constant 0 : index
    %42 = vector.load %arg6[%c0_40, %c0_41] : memref<8x1xf32, #tpu.memory_space<vmem>>, vector<8x1xf32>
    %43 = vector.broadcast %42 : vector<8x1xf32> to vector<8x128xf32>
    %44 = arith.addf %41, %43 : vector<8x128xf32>
    %cst_42 = arith.constant 0.000000e+00 : f32
    %45 = vector.broadcast %cst_42 : f32 to vector<8x128xf32>
    %46 = arith.maximumf %44, %45 : vector<8x128xf32>
    %c0_43 = arith.constant 0 : index
    %c0_44 = arith.constant 0 : index
    %c0_45 = arith.constant 0 : index
    %47 = vector.load %arg7[%c0_43, %c0_44, %c0_45] : memref<1x8x128xf32, #tpu.memory_space<vmem>>, vector<1x8x128xf32>
    %48 = vector.shape_cast %47 : vector<1x8x128xf32> to vector<8x128xf32>
    %49 = vector.shape_cast %46 : vector<8x128xf32> to vector<1x8x128xf32>
    tpu.vector_store %arg7[%c0_43, %c0_44, %c0_45], %49 {strides = array<i32>} : memref<1x8x128xf32, #tpu.memory_space<vmem>>, vector<1x8x128xf32>,
    return
  }
  func.func @transform_0(%arg0: i32) -> (i32, i32, i32) {
    %c0_i32 = arith.constant 0 : i32
    %c0_i32_0 = arith.constant 0 : i32
    %c0_i32_1 = arith.constant 0 : i32
    return %arg0, %c0_i32, %c0_i32_0 : i32, i32, i32
  }
  func.func @transform_1(%arg0: i32) -> (i32, i32) {
    %c0_i32 = arith.constant 0 : i32
    %c0_i32_0 = arith.constant 0 : i32
    %c0_i32_1 = arith.constant 0 : i32
    return %c0_i32, %c0_i32_0 : i32, i32
  }
  func.func @transform_2(%arg0: i32) -> (i32, i32) {
    %c0_i32 = arith.constant 0 : i32
    %c0_i32_0 = arith.constant 0 : i32
    %c0_i32_1 = arith.constant 0 : i32
    return %c0_i32, %c0_i32_0 : i32, i32
  }
  func.func @transform_3(%arg0: i32) -> (i32, i32) {
    %c0_i32 = arith.constant 0 : i32
    %c0_i32_0 = arith.constant 0 : i32
    %c0_i32_1 = arith.constant 0 : i32
    return %c0_i32, %c0_i32_0 : i32, i32
  }
  func.func @transform_4(%arg0: i32) -> (i32, i32) {
    %c0_i32 = arith.constant 0 : i32
    %c0_i32_0 = arith.constant 0 : i32
    %c0_i32_1 = arith.constant 0 : i32
    return %c0_i32, %c0_i32_0 : i32, i32
  }
  func.func @transform_5(%arg0: i32) -> (i32, i32) {
    %c0_i32 = arith.constant 0 : i32
    %c0_i32_0 = arith.constant 0 : i32
    %c0_i32_1 = arith.constant 0 : i32
    return %c0_i32, %c0_i32_0 : i32, i32
  }
  func.func @transform_6(%arg0: i32) -> (i32, i32, i32) {
    %c0_i32 = arith.constant 0 : i32
    %c0_i32_0 = arith.constant 0 : i32
    %c0_i32_1 = arith.constant 0 : i32
    return %arg0, %c0_i32, %c0_i32_0 : i32, i32, i32
  }
}

</mosaic_0001>

<bundles_post_ra>
// kernel: residual_block_forward.1
= control target key start
LH: loop header
LB: loop body
LE: loop exit
PB: predicated region body
PF: predicated region fallthrough
CT: control target
= control target key end

     0   :  { %11 = vsyncpa [#allocation6], 0  ;;  %s832_s0 = inlined_call_operand.vmem [shape: bf16[2,8,256], index: 0, kind: input, shape index: {}]   ;;  %s833_s1 = inlined_call_operand.vmem [shape: bf16[16,12], index: 1, kind: input, shape index: {}]   ;;  %s834_s2 = inlined_call_operand.vmem [shape: f32[8,1], index: 2, kind: input, shape index: {}]   ;;  %s835_s3 = inlined_call_operand.vmem [shape: bf16[8,24], index: 3, kind: input, shape index: {}]   ;;  %s836_s4 = inlined_call_operand.vmem [shape: f32[8,1], index: 4, kind: input, shape index: {}]   ;;  %s837_s5 = inlined_call_operand.vmem [shape: f32[8,1], index: 5, kind: input, shape index: {}]   ;;  %s838_s6 = inlined_call_operand.hbm [shape: f32[2,8,128], index: 6, kind: output, shape index: {}]  }
   0x1   :  { %13 = vsyncpa [#allocation6 + $0x1], 0  ;;  %s708_s21 = smov 0   ;;  %s710_s22 = smov 0  }
   0x2   :  { %s712_s23 = smov 0   ;;  %s714_s24 = smov 0  }
   0x3 LB: > { %s729_s25 = sadd.s32 4294967295, %s665_s24   ;;  %s514_s26 = sadd.s32 4294967294, %s665_s24   ;;  %s665_s24 = sphi %s714_s24, %s844_s24   ;;  %s661_s23 = sphi %s712_s23, %s843_s23   ;;  %s657_s22 = sphi %s710_s22, %s842_s22   ;;  %s653_s21 = sphi %s708_s21, %s841_s21  }
   0x4   : > { %s733_s27 = sadd.s32 1, %s665_s24   ;;  %s157_s28 = sadd.s32 1, %s661_s23 }
   0x5   : > { %s154_s29 = ssub.s32 %s665_s24, %s733_s27  ;;  %p167_p0 = scmp.ne.s32.totalorder %s661_s23, %s657_s22 }
   0x6   : > { %p155_p1 = scmp.eq.s32.totalorder %s154_s29, 0  ;;  %p168_p2 = scmp.eq.s32.totalorder %s729_s25, 1 }
   0x7   : > { %p173_p3 = scmp.ne.s32.totalorder %s657_s22, %s653_s21  ;;  %p174_p4 = scmp.eq.s32.totalorder %s514_s26, 1 }
   0x8   : > { %s744_s30 = scalar_select %p155_p1, %s661_s23, %s157_s28  }
   0x9   : > { %p746_p5 = por %p168_p2, %p167_p0  ;;  %p750_p6 = por %p174_p4, %p173_p3 }
   0xa   : > { %p517_p7 = scmp.ge.s32.totalorder %s665_s24, 1  ;;  %p215_p8 = scmp.lt.s32.totalorder %s665_s24, 3 }
   0xc   : > { %p216_p9 = pnand %p517_p7, %p215_p8 }
   0xd   : > { %p245_p10 = scmp.lt.s32.totalorder (!%p216_p9), %s729_s25, 1  ;;  %v667_v0 = vmov (!%p216_p9), 0.0   ;;  %s668_s14 = smov (!%p216_p9), 127   ;;  %vm669_vm0 = vmmov (!%p216_p9), 0   ;;  %vm339_vm1 = vcmask (!%p216_p9), 1044472   ;;  %vm341_vm2 = vcmask (!%p216_p9), 3072  }
   0xe   : > { %219 = sbr.rel (%p216_p9) target bundleno = 760 (0x2f8), region = 44  ;;  %537 = vmatprep.subr.bf16.mxu0 (!%p216_p9), %v667_v0  ;;  %543 = vmatprep.subr.bf16.mxu1 (!%p216_p9), %v667_v0  ;;  %v327_v4 = vld [vmem:[%s834_s2] sm:$0xff] (!%p216_p9)  ;;  %v670_v5 = vmov (!%p216_p9), 0   ;;  %vm260_vm3 = vcmask (!%p216_p9), 1039360   ;;  %vm282_vm4 = vcmask (!%p216_p9), 1045504   ;;  %vm278_vm5 = vcmask (!%p216_p9), 97280  }
   0xf   : > { %539 = vmatprep.mubr.msk.bf16.mxu0 (!%p216_p9), %vm669_vm0, %v667_v0  ;;  %547 = vmatprep.mubr.msk.bf16.mxu1 (!%p216_p9), %vm669_vm0, %v667_v0  ;;  %340 = vst.msk [vmem:[#allocation3] sm:$0xf] (!%p216_p9), %vm339_vm1, %v670_v5  ;;  %v432_v6 = vld [vmem:[%s837_s5] sm:$0xff] (!%p216_p9)  ;;  %v335_v18 = vlaneseq (!%p216_p9)  ;;  %s671_s26 = smov (!%p216_p9), 1   ;;  %vm350_vm7 = vcmask (!%p216_p9), 7168   ;;  %vm387_vm8 = vcmask (!%p216_p9), 1043456  }
  0x10   : > { %595 = vset.pattern.permute.xlu0 (!%p216_p9), %v670_v5  ;;  %342 = vst.msk [vmem:[#allocation3 + $0x8] sm:$0xf] (!%p216_p9), %vm341_vm2, %v670_v5  ;;  %596 = vset.pattern.permute.xlu1 (!%p216_p9), %v670_v5  ;;  %v598_v12 = vld [vmem:[%s833_s1] sm:$0xff] (!%p216_p9)   ;;  %vm383_vm9 = vcmask (!%p216_p9), 195584   ;;  %s242_s11 = sand.u32 (!%p216_p9), 1, %s657_s22  }
  0x11   : > { %v336_v20 = vand.u32 (!%p216_p9), 127, %v335_v18  ;;  %v368_v27 = vld [vmem:[%s836_s4] sm:$0xff] (!%p216_p9)  ;;  %s518_s12 = sshll.u32 (!%p216_p9), %s242_s11, 3  ;;  %s442_s19 = scalar_lea.sflag (!%p216_p9), [#allocation6], %s242_s11 }
  0x12   : > { %v364_v37 = vld [vmem:[%s835_s3] sm:$0xf] (!%p216_p9) }
  0x13   : > { %vm337_vm6 = vcmp.lt.s32.totalorder (!%p216_p9), %v336_v20, 8 }
  0x15   : > { %s246_s9 = scalar_select %p245_p10, %s729_s25, 1 }
  0x17   : > { %s531_s10 = sshll.u32 %s246_s9, 3 }
  0x18   : > { %s249_s13 = scalar_lea.vmem %s832_s0, %s531_s10 }
  0x19   : > { %v255_v1 = vld [vmem:[%s249_s13] sm:$0x33]  ;;  %v253_v3 = vld [vmem:[%s249_s13] sm:$0xc] }
  0x1a   : > { %v251_v2 = vld [vmem:[%s249_s13] sm:$0x3]  ;;  %257 = vrot.lane.b32.xlu0 %v255_v1, %s668_s14  ;;  %254 = vst [vmem:[#allocation2] sm:$0xc] %v253_v3  ;;  %s528_s13 = sshll.u32 %s729_s25, 7  ;;  %s672_s25 = smov [#allocation5]  }
  0x1b   : > { %252 = vst [vmem:[#allocation2] sm:$0x3] %v251_v2  ;;  %s790_s18 = scalar_lea.hbm %s838_s6, %s528_s13 }
  0x1e   : > { %330 = vperm.xlu0 %595, %v327_v4  }
  0x22   : > { %435 = vperm.xlu0 %595, %v432_v6  }
  0x8c   : > { %v258_v7 = vpop.permute.xlu0 %257 }
  0x8d   : > { %v259_v8 = vrot.slane %v258_v7, 4 }
  0x8f   : > { %v261_v9 = vsel %vm260_vm3, %v258_v7, %v259_v8 }
  0x90   : > { %263 = vst [vmem:[#allocation2 + $0x4] sm:$0x3] %v261_v9 }
  0x97   : > { %v597_v10 = vld [vmem:[#allocation2] sm:$0x3f]  }
  0x98   : > { %v284_v11 = vsel %vm282_vm4, %v597_v10, 0 }
  0x99   : > { %538 = vmatpush3.bf16.msra.mxu0 %v284_v11 }
  0x9c   : > { %540 = vmatmul.mubr.msk.bf16.vlgmr.msra.gmra.mrb[0].mxu0 %vm278_vm5, %v598_v12 }
  0x9d   : > { %v331_v13 = vpop.permute.xlu0 %330 }
  0xa1   : > { %v436_v45 = vpop.permute.xlu0 %435 }
 0x16f   : > { %v320_v14 = vpop.f32.mrb[0].mxu0 }
 0x170   : > { %v333_v15 = vadd.f32 %v331_v13, %v320_v14  ;;  %v541_v16 = vpop.f32.mrb[1].mxu0 }
 0x171   : > { %v323_v17 = vpop.f32.mrb[2].mxu0 }
 0x172   : > { %601 = vtanh.f32 %v333_v15  ;;  %v542_v19 = vpop.f32.mrb[3].mxu0 }
 0x17c   : > { %v602_v21 = vpop.eup %601 }
 0x17d   : > { %v338_v22 = vsel %vm337_vm6, %v602_v21, 0.0 }
 0x17e   : > { %v343_v23 = vpack.c.bf16 %v338_v22, %v338_v22 }
 0x180   : > { %344 = vst [vmem:[#allocation3 + $0x4] sm:$0xf] %v343_v23 }
 0x187   : > { %v345_v24 = vld [vmem:[#allocation3] sm:$0xff] }
 0x188   : > { %v354_v25 = vld [vmem:[#allocation3 + $0x4] sm:$0xf]  ;;  %347 = vrot.lane.b32.xlu1 %v345_v24, %s671_s26  ;;  %s607_s26 = sshll.u32 %s672_s25, 4  ;;  %s608_s26 = int_to_ptr.vmem [resolvable:$false] %s607_s26 }
 0x189   : > { %355 = vst [vmem:[#allocation4 + $0x4] sm:$0xf] %v354_v25  ;;  %v356_v26 = vld [vmem:[#allocation3 + $0x4] sm:$0xff]  ;;  %s609_s28 = scalar_lea.vmem %s608_s26, 256 }
 0x18c   : > { %358 = vrot.lane.b32.xlu1 %v356_v26, %s668_s14  ;;  %s244_s14 = scalar_lea.vmem [#allocation5], %s518_s12 }
 0x18d   : > { %s455_s15 = sshll.u32 %s244_s14, 4  ;;  %s792_s15 = int_to_ptr.vmem [resolvable:$true] %s455_s15 }
 0x18e   : > { %s603_s20 = scalar_lea.vmem %s792_s15, 128  ;;  %p610_p0 = scmp.lt.s32.totalorder %s792_s15, %s608_s26 }
 0x18f   : > { %p604_p11 = scmp.ne.s32.totalorder %s792_s15, %s603_s20  ;;  %p611_p1 = scmp.lt.s32.totalorder %s609_s28, %s603_s20 }
 0x190   : > { %371 = vperm.xlu1 %596, %v368_v27  }
 0x191   : > { %p605_p12 = pnand %p604_p11, %p746_p5  ;;  %p612_p2 = por %p611_p1, %p610_p0 }
 0x193   : > { %p606_p13 = pneg %p605_p12 }
 0x195   : > { %p613_p3 = pnand %p612_p2, %p606_p13 }
 0x1fa   : > { %v348_v28 = vpop.permute.xlu1 %347 }
 0x1fb   : > { %v349_v29 = vrot.slane %v348_v28, 4 }
 0x1fd   : > { %v351_v30 = vsel %vm350_vm7, %v348_v28, %v349_v29 }
 0x1fe   : > { %353 = vst [vmem:[#allocation4] sm:$0xf] %v351_v30  ;;  %v359_v31 = vpop.permute.xlu1 %358 }
 0x1ff   : > { %v360_v32 = vrot.slane %v359_v31, 4 }
 0x201   : > { %v361_v33 = vsel %vm260_vm3, %v359_v31, %v360_v32 }
 0x202   : > { %363 = vst [vmem:[#allocation4 + $0x8] sm:$0xf] %v361_v33 }
 0x205   : > { %v599_v34 = vld [vmem:[#allocation4] sm:$0xff]  }
 0x206   : > { %544 = vmatpush3.bf16.msra.mxu1 %v599_v34 }
 0x207   : > { %545 = vmatprep.subr.bf16.mxu1 %v667_v0 }
 0x209   : > { %v600_v35 = vld [vmem:[#allocation4 + $0x8] ss:$0 sps:$4 sm:$0xff]  }
 0x20a   : > { %v389_v36 = vsel %vm387_vm8, %v600_v35, 0 }
 0x20b   : > { %546 = vmatpush3.bf16.msra.mxu1 %v389_v36 }
 0x20e   : > { %548 = vmatmul.mubr.msk.bf16.vlgmr.msra.gmra.mrb[0].mxu1 %vm383_vm9, %v364_v37 }
 0x20f   : > { %v372_v38 = vpop.permute.xlu1 %371 }
 0x2e1   : > { %v425_v39 = vpop.f32.mrb[0].mxu1 }
 0x2e2   : > { %v426_v40 = vadd.f32 %v425_v39, %v372_v38  ;;  %v549_v41 = vpop.f32.mrb[1].mxu1 }
 0x2e3   : > { %v428_v42 = vpop.f32.mrb[2].mxu1 }
 0x2e4   : > { %v431_v43 = vadd.f32 %v426_v40, %v323_v17  ;;  %v550_v44 = vpop.f32.mrb[3].mxu1 }
 0x2e6   : > { %v438_v46 = vadd.f32 %v436_v45, %v431_v43 }
 0x2e8   : > { %v439_v47 = vmax.f32 %v438_v46, 0.0 }
 0x2ea   : > { %440 = vst [vmem:[%s244_s14] sm:$0xff] %v439_v47 }
 0x2eb   : > { %616 = shalt.err (!%p613_p3)
}
 0x2ec   : > { %s617_s29 = scalar_lea.hbm %s790_s18, 128  ;;  %s621_s11 = scalar_lea.hbm %s838_s6, 256 }
 0x2ed   : > { %p618_p4 = scmp.ne.s32.totalorder %s790_s18, %s617_s29  ;;  %p622_p9 = scmp.lt.u32.totalorder %s790_s18, %s838_s6 }
 0x2ee   : > { %p623_p10 = scmp.lt.u32.totalorder %s621_s11, %s617_s29  ;;  %p625_p12 = scmp.lt.u32.totalorder %s617_s29, %s790_s18 }
 0x2ef   : > { %p619_p7 = pnand %p618_p4, %p746_p5 }
 0x2f0   : > { %p624_p11 = por %p623_p10, %p622_p9 }
 0x2f1   : > { %p620_p8 = pneg %p619_p7 }
 0x2f2   : > { %p626_p13 = por %p625_p12, %p624_p11 }
 0x2f4   : > { %p627_p0 = pnand %p626_p13, %p620_p8 }
 0x2f6   : > { %630 = shalt.err (!%p627_p0)
}
 0x2f7   : > { %551 = dma.vmem_to_hbm [thread:$0]  (%p746_p5), %s792_s15, 128, %s790_s18, %s442_s19  }
 0x2f8 PF: > { %p557_p1 = scmp.ge.s32.totalorder %s665_s24, 2  ;;  %s467_s14 = sand.u32 1, %s653_s21  }
 0x2f9   : > { %s468_s16 = scalar_lea.sflag [#allocation6], %s467_s14 }
 0x2fa   : > { %p554_p2 = pnand %p557_p1, %p750_p6 }
 0x2fc   : > { %648 = dma.done.wait (!%p554_p2), %s468_s16, 128  }
 0x2fd   : > { %650 = vsyncadd (!%p554_p2), %s468_s16, 4294967168  ;;  %p16_p3 = scmp.ge.s32.totalorder %s733_s27, 4   ;;  %s841_s21 = smov %s657_s22 }
 0x2fe   : > { %s842_s22 = smov %s661_s23  ;;  %s843_s23 = smov %s744_s30 }
 0x2ff   : > { %s844_s24 = smov %s733_s27  ;;  %18 = sbr.rel (!%p16_p3) target bundleno = 3 (0x3), region = 79 }
 0x306   :  { %473 = vsyncpa [#allocation6], 1 }
 0x307   :  { %475 = vsyncpa [#allocation6 + $0x1], 1 }

</bundles_post_ra>
